<compile_context>
chip_gen: v7x
topology: tpu7x:2x2x1
jax: 0.10.0
libtpu: 0.0.40
codegen_flags: <defaults>
</compile_context>

<pallas_src>
import functools

import jax
import jax.numpy as jnp
from jax.experimental import pallas as pl
from jax.experimental.pallas import tpu as pltpu


# ----------------------------------------------------------------------------
# Kernel 1: fused qkv projection + local-window online softmax (roll + mask)
# ----------------------------------------------------------------------------
def _lsa_attn_kernel(K, pad, H, W, x_ref, w_ref, rel_ref, mask_ref,
                     o_ref, sum_ref, sq_ref):
    # x_ref:    (1, Cin, H*W)   bf16, NCHW flattened
    # w_ref:    (3*Cout, Cin)   bf16, rows = [Wq; Wk; Wv]
    # rel_ref:  (Cout, K*K)     f32, rel[c, i*K + j]
    # mask_ref: (K*K, H*W)      f32 {0,1}; 0 where window pos (i,j) lands in padding
    # o_ref:    (1, Cout, H*W)  f32
    # sum_ref:  (1, Cout, 1)    f32  per-channel sum of the attention output
    # sq_ref:   (1, Cout, 1)    f32  per-channel sum of squares
    Cout = o_ref.shape[1]
    HW = H * W

    # ---- fused q/k/v 1x1 conv: one bf16 MXU matmul, f32 accumulation --------
    qkv = jnp.dot(w_ref[...], x_ref[0],
                  preferred_element_type=jnp.float32)            # (3*Cout, H*W)
    q = qkv[0:Cout]
    k = qkv[Cout:2 * Cout]
    v = qkv[2 * Cout:3 * Cout]

    def window(idx):
        # Window offset (i, j) -> image shift (dh, dw).  A flat lane roll by
        # dh*W + dw reproduces the 2-D shift; the precomputed mask zeroes every
        # position whose shifted source falls outside the image, matching the
        # reference (zero-padded k/v => rel-only logits, zero v contribution).
        i, j = idx // K, idx % K
        shift = (-((i - pad) * W + (j - pad))) % HW              # static int
        if shift == 0:
            k_s, v_s = k, v
        else:
            k_s = pltpu.roll(k, shift, axis=1)
            v_s = pltpu.roll(v, shift, axis=1)
        m_row = mask_ref[idx:idx + 1, :]                         # (1, H*W)
        kwin = k_s * m_row
        vwin = v_s * m_row
        rel_c = rel_ref[:, idx:idx + 1]                          # (Cout, 1)
        return q * (kwin + rel_c), vwin                          # per-channel logits

    # ---- online (flash-style) softmax over the K*K window, all f32 ----------
    logit, vwin = window(0)
    m = logit
    denom = jnp.ones_like(logit)                                 # exp(logit - m) == 1
    num = vwin
    for idx in range(1, K * K):
        logit, vwin = window(idx)
        m_new = jnp.maximum(m, logit)
        alpha = jnp.exp(m - m_new)
        p = jnp.exp(logit - m_new)
        denom = denom * alpha + p
        num = num * alpha + p * vwin
        m = m_new

    res = num * pl.reciprocal(denom, approx=True)                # (Cout, H*W)

    o_ref[0] = res.astype(o_ref.dtype)                           # lane-dense store
    sum_ref[0] = jnp.sum(res, axis=1, keepdims=True)             # fused BN1 stats
    sq_ref[0] = jnp.sum(res * res, axis=1, keepdims=True)


def _window_masks(H, W, K, pad):
    # mask[idx, h*W + w] == 1 iff window position idx=(i,j) at output (h,w)
    # falls inside the (unpadded) image.
    hh = jnp.arange(H)[:, None]
    ww = jnp.arange(W)[None, :]
    rows = []
    for idx in range(K * K):
        dh, dw = idx // K - pad, idx % K - pad
        m = (hh + dh >= 0) & (hh + dh < H) & (ww + dw >= 0) & (ww + dw < W)
        rows.append(m.reshape(H * W))
    return jnp.stack(rows).astype(jnp.float32)                   # (K*K, H*W)


def lsa_attention(x_flat, *, H, W, K, pad, w_qkv, rel):
    B, Cin, HW = x_flat.shape
    C3 = w_qkv.shape[0]
    Cout = C3 // 3
    assert HW == H * W and 2 * pad == K - 1

    masks = _window_masks(H, W, K, pad)

    # Explicit scoped-VMEM budget: double-buffered in/out blocks + f32 working set.
    in_bytes = Cin * HW * 2 + C3 * Cin * 2 + Cout * K * K * 4 + K * K * HW * 4
    out_bytes = Cout * HW * 4 + 2 * Cout * 4
    work_bytes = 12 * Cout * HW * 4
    vmem_limit = min(2 * (in_bytes + out_bytes) + work_bytes + (8 << 20), 100 << 20)

    kernel = functools.partial(_lsa_attn_kernel, K, pad, H, W)
    attn, sums, sumsq = pl.pallas_call(
        kernel,
        out_shape=(
            jax.ShapeDtypeStruct((B, Cout, HW), jnp.float32),
            jax.ShapeDtypeStruct((B, Cout, 1), jnp.float32),
            jax.ShapeDtypeStruct((B, Cout, 1), jnp.float32),
        ),
        grid=(B,),
        in_specs=[
            pl.BlockSpec((1, Cin, HW), lambda b: (b, 0, 0)),
            pl.BlockSpec((C3, Cin), lambda b: (0, 0)),
            pl.BlockSpec((Cout, K * K), lambda b: (0, 0)),
            pl.BlockSpec((K * K, HW), lambda b: (0, 0)),
        ],
        out_specs=(
            pl.BlockSpec((1, Cout, HW), lambda b: (b, 0, 0)),
            pl.BlockSpec((1, Cout, 1), lambda b: (b, 0, 0)),
            pl.BlockSpec((1, Cout, 1), lambda b: (b, 0, 0)),
        ),
        compiler_params=pltpu.CompilerParams(
            dimension_semantics=("parallel",),
            vmem_limit_bytes=vmem_limit),
    )(x_flat.astype(jnp.bfloat16), w_qkv.astype(jnp.bfloat16),
      rel.astype(jnp.float32), masks)
    return attn, sums, sumsq


# ----------------------------------------------------------------------------
# Kernel 2: fused BN1-affine + ReLU + `agg` 1x1 conv (tiled, bf16 MXU)
# ----------------------------------------------------------------------------
def _agg_kernel(x_ref, scale_ref, shift_ref, w_ref, o_ref):
    # x_ref: (1, Ci, tn) f32;  scale/shift: (Ci, 1) f32;  w_ref: (Co, Ci) bf16
    h = x_ref[0] * scale_ref[...] + shift_ref[...]               # BN1 affine (post-stats)
    h = jnp.maximum(h, 0.0)                                      # ReLU
    o_ref[0] = jnp.dot(w_ref[...], h.astype(jnp.bfloat16),
                       preferred_element_type=jnp.float32).astype(o_ref.dtype)


def _pick_col_tile(HW, Ci, Co, budget_bytes=16 << 20):
    # Largest lane tile dividing H*W whose double-buffered in/out footprint
    # stays under the budget (per-grid-step overhead ~0.35 us, so bigger is
    # better until VMEM pressure / pipelining headroom).
    for tn in (4096, 2048, 1024, 512, 256, 128):
        if HW % tn == 0 and 2 * (Ci + Co) * tn * 4 <= budget_bytes:
            return tn
    return HW


def agg_conv(x_flat, scale, shift, w_agg):
    B, Ci, HW = x_flat.shape
    Co = w_agg.shape[0]
    tn = _pick_col_tile(HW, Ci, Co)
    vmem_limit = min(2 * ((Ci + Co) * tn * 4 + Ci * 8 + Co * Ci * 2)
                     + 4 * Ci * tn * 4 + (4 << 20), 100 << 20)
    return pl.pallas_call(
        _agg_kernel,
        out_shape=jax.ShapeDtypeStruct((B, Co, HW), jnp.float32),
        grid=(B, HW // tn),
        in_specs=[
            pl.BlockSpec((1, Ci, tn), lambda b, n: (b, 0, n)),
            pl.BlockSpec((Ci, 1), lambda b, n: (0, 0)),
            pl.BlockSpec((Ci, 1), lambda b, n: (0, 0)),
            pl.BlockSpec((Co, Ci), lambda b, n: (0, 0)),
        ],
        out_specs=pl.BlockSpec((1, Co, tn), lambda b, n: (b, 0, n)),
        compiler_params=pltpu.CompilerParams(
            dimension_semantics=("parallel", "parallel"),
            vmem_limit_bytes=vmem_limit),
    )(x_flat, scale.reshape(Ci, 1), shift.reshape(Ci, 1),
      w_agg.astype(jnp.bfloat16))


# ----------------------------------------------------------------------------
# Plain-JAX glue: training-mode BatchNorm2d batch statistics
# ----------------------------------------------------------------------------
def _bn_scale_shift_from_moments(sums, sumsq, count, gamma, beta, eps=1e-5):
    # Moments were accumulated inside the attention kernel (no extra HBM pass).
    total = jnp.sum(sums[:, :, 0], axis=0)                       # (C,)
    total_sq = jnp.sum(sumsq[:, :, 0], axis=0)                   # (C,)
    mean = total / count
    var = jnp.maximum(total_sq / count - mean * mean, 0.0)       # biased, train-mode BN
    scale = gamma / jnp.sqrt(var + eps)
    shift = beta - mean * scale
    return scale, shift


def local_self_attention_forward(x_nchw, params, *, K, S, pad, groups):
    # `groups` only drives reshapes in the reference forward; per-channel math
    # is identical, so it does not change the result.
    del groups
    assert S == 1 and 2 * pad == K - 1, "reference forward requires unfold output == (H, W)"
    B, Cin, H, W = x_nchw.shape
    x_flat = x_nchw.reshape(B, Cin, H * W)            # free reshape, stays NCHW-ordered

    attn, sums, sumsq = lsa_attention(
        x_flat, H=H, W=W, K=K, pad=pad,
        w_qkv=params['w_qkv'], rel=params['rel'])                # (B, Cout, H*W)

    # agg: BN (batch stats) -> ReLU -> 1x1 conv -> BN ; BN1-affine + ReLU + conv fused.
    count = B * H * W
    s1, b1 = _bn_scale_shift_from_moments(sums, sumsq, count,
                                          params['bn1_gamma'], params['bn1_beta'])
    y = agg_conv(attn, s1, b1, params['w_agg'])                  # (B, Cout, H*W)

    # BN2 batch statistics + affine in plain JAX (global reduction over (B, H*W)).
    mean2 = jnp.mean(y, axis=(0, 2))
    var2 = jnp.var(y, axis=(0, 2))
    s2 = params['bn2_gamma'] / jnp.sqrt(var2 + 1e-5)
    b2 = params['bn2_beta'] - mean2 * s2
    y = y * s2[None, :, None] + b2[None, :, None]

    Cout = y.shape[1]
    return y.reshape(B, Cout, H, W)                   # NCHW, same as the PyTorch module


# ----------------------------------------------------------------------------
# Parameter init matching the PyTorch module's reset_parameters / defaults
# ----------------------------------------------------------------------------
def init_params(key, Cin, Cout, K):
    assert Cout % 2 == 0
    ks = jax.random.split(key, 6)
    # kaiming_normal_(mode='fan_out', nonlinearity='relu') for 1x1 convs:
    # fan_out = Cout, std = sqrt(2 / Cout).  Weights stored as (Cout, Cin).
    std = (2.0 / Cout) ** 0.5
    wq = std * jax.random.normal(ks[0], (Cout, Cin), jnp.float32)
    wk = std * jax.random.normal(ks[1], (Cout, Cin), jnp.float32)
    wv = std * jax.random.normal(ks[2], (Cout, Cin), jnp.float32)
    w_qkv = jnp.concatenate([wq, wk, wv], axis=0)                 # (3*Cout, Cin)

    # rel_h: (Cout//2,1,1,K,1) -> rel_h[c, i];  rel_w: (Cout//2,1,1,1,K) -> rel_w[c, j]
    rel_h = jax.random.normal(ks[3], (Cout // 2, K), jnp.float32)
    rel_w = jax.random.normal(ks[4], (Cout // 2, K), jnp.float32)
    rel_hc = jnp.broadcast_to(rel_h[:, :, None], (Cout // 2, K, K))   # (c, i, j)
    rel_wc = jnp.broadcast_to(rel_w[:, None, :], (Cout // 2, K, K))   # (c, i, j)
    rel = jnp.concatenate([rel_hc, rel_wc], axis=0).reshape(Cout, K * K)

    # agg 1x1 conv: PyTorch default kaiming_uniform(a=sqrt(5)) -> bound = 1/sqrt(fan_in)
    bound = 1.0 / (Cout ** 0.5)
    w_agg = jax.random.uniform(ks[5], (Cout, Cout), jnp.float32, -bound, bound)  # (out, in)

    return dict(
        w_qkv=w_qkv, rel=rel, w_agg=w_agg,
        bn1_gamma=jnp.ones((Cout,), jnp.float32),
        bn1_beta=jnp.zeros((Cout,), jnp.float32),
        bn2_gamma=jnp.ones((Cout,), jnp.float32),
        bn2_beta=jnp.zeros((Cout,), jnp.float32),
    )


if __name__ == "__main__":
    B, Cin, H, W = 2, 4, 16, 16
    Cout, K, S, pad, groups = 8, 3, 1, 1, 1

    key = jax.random.PRNGKey(0)
    kx, kp = jax.random.split(key)
    x = jax.random.normal(kx, (B, Cin, H, W), jnp.float32)  # NCHW, like PyTorch
    params = init_params(kp, Cin, Cout, K)

    out = local_self_attention_forward(x, params, K=K, S=S, pad=pad, groups=groups)
    out = jax.block_until_ready(out)
    assert out.shape == (B, Cout, H, W)
    assert bool(jnp.all(jnp.isfinite(out)))
    print("KERNEL_OK")
</pallas_src>

<mosaic_0001>
module attributes {stable_mosaic.version = 11 : i64} {
  func.func @_lsa_attn_kernel(%arg0: i32, %arg1: memref<1x4x256xbf16, #tpu.memory_space<vmem>>, %arg2: memref<24x4xbf16, #tpu.memory_space<vmem>>, %arg3: memref<8x9xf32, #tpu.memory_space<vmem>>, %arg4: memref<9x256xf32, #tpu.memory_space<vmem>>, %arg5: memref<1x8x256xf32, #tpu.memory_space<vmem>>, %arg6: memref<1x8x1xf32, #tpu.memory_space<vmem>>, %arg7: memref<1x8x1xf32, #tpu.memory_space<vmem>>) attributes {dimension_semantics = [#tpu.dimension_semantics<parallel>], iteration_bounds = array<i64: 2>, scalar_prefetch = 0 : i64, scratch_operands = 0 : i64, tpu.core_type = #tpu.core_type<tc>, window_params = [{transform_indices = @transform_0, window_bounds = array<i64: 1, 4, 256>}, {pipeline_mode = #tpu.pipeline_mode<synchronous>, transform_indices = @transform_1, window_bounds = array<i64: 24, 4>}, {pipeline_mode = #tpu.pipeline_mode<synchronous>, transform_indices = @transform_2, window_bounds = array<i64: 8, 9>}, {pipeline_mode = #tpu.pipeline_mode<synchronous>, transform_indices = @transform_3, window_bounds = array<i64: 9, 256>}, {transform_indices = @transform_4, window_bounds = array<i64: 1, 8, 256>}, {transform_indices = @transform_5, window_bounds = array<i64: 1, 8, 1>}, {transform_indices = @transform_6, window_bounds = array<i64: 1, 8, 1>}]} {
    %c0 = arith.constant 0 : index
    %c0_0 = arith.constant 0 : index
    %0 = vector.load %arg2[%c0, %c0_0] : memref<24x4xbf16, #tpu.memory_space<vmem>>, vector<24x4xbf16>
    %c0_1 = arith.constant 0 : index
    %c0_2 = arith.constant 0 : index
    %c0_3 = arith.constant 0 : index
    %1 = vector.load %arg1[%c0_1, %c0_2, %c0_3] : memref<1x4x256xbf16, #tpu.memory_space<vmem>>, vector<1x4x256xbf16>
    %2 = vector.shape_cast %1 : vector<1x4x256xbf16> to vector<4x256xbf16>
    %cst = arith.constant dense<0.000000e+00> : vector<24x256xf32>
    %3 = tpu.matmul %0, %2, %cst {dimension_numbers = #tpu.dot_dimension_numbers<[1], [0], [0], [1], [0, 0, 1, 1], [], []>} : vector<24x4xbf16>, vector<4x256xbf16>, vector<24x256xf32> -> vector<24x256xf32>
    %4 = vector.extract_strided_slice %3 {offsets = [0, 0], sizes = [8, 256], strides = [1, 1]} : vector<24x256xf32> to vector<8x256xf32>
    %5 = vector.extract_strided_slice %3 {offsets = [8, 0], sizes = [8, 256], strides = [1, 1]} : vector<24x256xf32> to vector<8x256xf32>
    %6 = vector.extract_strided_slice %3 {offsets = [16, 0], sizes = [8, 256], strides = [1, 1]} : vector<24x256xf32> to vector<8x256xf32>
    %c17_i32 = arith.constant 17 : i32
    %7 = tpu.dynamic_rotate %5 by %c17_i32 dim 1 : vector<8x256xf32>, i32 -> vector<8x256xf32>
    %c17_i32_4 = arith.constant 17 : i32
    %8 = tpu.dynamic_rotate %6 by %c17_i32_4 dim 1 : vector<8x256xf32>, i32 -> vector<8x256xf32>
    %c0_5 = arith.constant 0 : index
    %c0_6 = arith.constant 0 : index
    %9 = vector.load %arg4[%c0_5, %c0_6] : memref<9x256xf32, #tpu.memory_space<vmem>>, vector<1x256xf32>
    %10 = vector.broadcast %9 : vector<1x256xf32> to vector<8x256xf32>
    %11 = arith.mulf %7, %10 : vector<8x256xf32>
    %12 = vector.broadcast %9 : vector<1x256xf32> to vector<8x256xf32>
    %13 = arith.mulf %8, %12 : vector<8x256xf32>
    %c0_7 = arith.constant 0 : index
    %c0_8 = arith.constant 0 : index
    %14 = vector.load %arg3[%c0_7, %c0_8] : memref<8x9xf32, #tpu.memory_space<vmem>>, vector<8x1xf32>
    %15 = vector.broadcast %14 : vector<8x1xf32> to vector<8x256xf32>
    %16 = arith.addf %11, %15 : vector<8x256xf32>
    %17 = arith.mulf %4, %16 : vector<8x256xf32>
    %cst_9 = arith.constant 1.000000e+00 : f32
    %18 = vector.broadcast %cst_9 : f32 to vector<8x256xf32>
    %c16_i32 = arith.constant 16 : i32
    %19 = tpu.dynamic_rotate %5 by %c16_i32 dim 1 : vector<8x256xf32>, i32 -> vector<8x256xf32>
    %c16_i32_10 = arith.constant 16 : i32
    %20 = tpu.dynamic_rotate %6 by %c16_i32_10 dim 1 : vector<8x256xf32>, i32 -> vector<8x256xf32>
    %c1 = arith.constant 1 : index
    %c0_11 = arith.constant 0 : index
    %21 = vector.load %arg4[%c1, %c0_11] : memref<9x256xf32, #tpu.memory_space<vmem>>, vector<1x256xf32>
    %22 = vector.broadcast %21 : vector<1x256xf32> to vector<8x256xf32>
    %23 = arith.mulf %19, %22 : vector<8x256xf32>
    %24 = vector.broadcast %21 : vector<1x256xf32> to vector<8x256xf32>
    %25 = arith.mulf %20, %24 : vector<8x256xf32>
    %c0_12 = arith.constant 0 : index
    %c1_13 = arith.constant 1 : index
    %26 = vector.load %arg3[%c0_12, %c1_13] : memref<8x9xf32, #tpu.memory_space<vmem>>, vector<8x1xf32>
    %27 = vector.broadcast %26 : vector<8x1xf32> to vector<8x256xf32>
    %28 = arith.addf %23, %27 : vector<8x256xf32>
    %29 = arith.mulf %4, %28 : vector<8x256xf32>
    %30 = arith.maximumf %17, %29 : vector<8x256xf32>
    %31 = arith.subf %17, %30 : vector<8x256xf32>
    %32 = math.exp %31 : vector<8x256xf32>
    %33 = arith.subf %29, %30 : vector<8x256xf32>
    %34 = math.exp %33 : vector<8x256xf32>
    %35 = arith.mulf %18, %32 : vector<8x256xf32>
    %36 = arith.addf %35, %34 : vector<8x256xf32>
    %37 = arith.mulf %13, %32 : vector<8x256xf32>
    %38 = arith.mulf %34, %25 : vector<8x256xf32>
    %39 = arith.addf %37, %38 : vector<8x256xf32>
    %c15_i32 = arith.constant 15 : i32
    %40 = tpu.dynamic_rotate %5 by %c15_i32 dim 1 : vector<8x256xf32>, i32 -> vector<8x256xf32>
    %c15_i32_14 = arith.constant 15 : i32
    %41 = tpu.dynamic_rotate %6 by %c15_i32_14 dim 1 : vector<8x256xf32>, i32 -> vector<8x256xf32>
    %c2 = arith.constant 2 : index
    %c0_15 = arith.constant 0 : index
    %42 = vector.load %arg4[%c2, %c0_15] : memref<9x256xf32, #tpu.memory_space<vmem>>, vector<1x256xf32>
    %43 = vector.broadcast %42 : vector<1x256xf32> to vector<8x256xf32>
    %44 = arith.mulf %40, %43 : vector<8x256xf32>
    %45 = vector.broadcast %42 : vector<1x256xf32> to vector<8x256xf32>
    %46 = arith.mulf %41, %45 : vector<8x256xf32>
    %c0_16 = arith.constant 0 : index
    %c2_17 = arith.constant 2 : index
    %47 = vector.load %arg3[%c0_16, %c2_17] : memref<8x9xf32, #tpu.memory_space<vmem>>, vector<8x1xf32>
    %48 = vector.broadcast %47 : vector<8x1xf32> to vector<8x256xf32>
    %49 = arith.addf %44, %48 : vector<8x256xf32>
    %50 = arith.mulf %4, %49 : vector<8x256xf32>
    %51 = arith.maximumf %30, %50 : vector<8x256xf32>
    %52 = arith.subf %30, %51 : vector<8x256xf32>
    %53 = math.exp %52 : vector<8x256xf32>
    %54 = arith.subf %50, %51 : vector<8x256xf32>
    %55 = math.exp %54 : vector<8x256xf32>
    %56 = arith.mulf %36, %53 : vector<8x256xf32>
    %57 = arith.addf %56, %55 : vector<8x256xf32>
    %58 = arith.mulf %39, %53 : vector<8x256xf32>
    %59 = arith.mulf %55, %46 : vector<8x256xf32>
    %60 = arith.addf %58, %59 : vector<8x256xf32>
    %c1_i32 = arith.constant 1 : i32
    %61 = tpu.dynamic_rotate %5 by %c1_i32 dim 1 : vector<8x256xf32>, i32 -> vector<8x256xf32>
    %c1_i32_18 = arith.constant 1 : i32
    %62 = tpu.dynamic_rotate %6 by %c1_i32_18 dim 1 : vector<8x256xf32>, i32 -> vector<8x256xf32>
    %c3 = arith.constant 3 : index
    %c0_19 = arith.constant 0 : index
    %63 = vector.load %arg4[%c3, %c0_19] : memref<9x256xf32, #tpu.memory_space<vmem>>, vector<1x256xf32>
    %64 = vector.broadcast %63 : vector<1x256xf32> to vector<8x256xf32>
    %65 = arith.mulf %61, %64 : vector<8x256xf32>
    %66 = vector.broadcast %63 : vector<1x256xf32> to vector<8x256xf32>
    %67 = arith.mulf %62, %66 : vector<8x256xf32>
    %c0_20 = arith.constant 0 : index
    %c3_21 = arith.constant 3 : index
    %68 = vector.load %arg3[%c0_20, %c3_21] : memref<8x9xf32, #tpu.memory_space<vmem>>, vector<8x1xf32>
    %69 = vector.broadcast %68 : vector<8x1xf32> to vector<8x256xf32>
    %70 = arith.addf %65, %69 : vector<8x256xf32>
    %71 = arith.mulf %4, %70 : vector<8x256xf32>
    %72 = arith.maximumf %51, %71 : vector<8x256xf32>
    %73 = arith.subf %51, %72 : vector<8x256xf32>
    %74 = math.exp %73 : vector<8x256xf32>
    %75 = arith.subf %71, %72 : vector<8x256xf32>
    %76 = math.exp %75 : vector<8x256xf32>
    %77 = arith.mulf %57, %74 : vector<8x256xf32>
    %78 = arith.addf %77, %76 : vector<8x256xf32>
    %79 = arith.mulf %60, %74 : vector<8x256xf32>
    %80 = arith.mulf %76, %67 : vector<8x256xf32>
    %81 = arith.addf %79, %80 : vector<8x256xf32>
    %c4 = arith.constant 4 : index
    %c0_22 = arith.constant 0 : index
    %82 = vector.load %arg4[%c4, %c0_22] : memref<9x256xf32, #tpu.memory_space<vmem>>, vector<1x256xf32>
    %83 = vector.broadcast %82 : vector<1x256xf32> to vector<8x256xf32>
    %84 = arith.mulf %5, %83 : vector<8x256xf32>
    %85 = vector.broadcast %82 : vector<1x256xf32> to vector<8x256xf32>
    %86 = arith.mulf %6, %85 : vector<8x256xf32>
    %c0_23 = arith.constant 0 : index
    %c4_24 = arith.constant 4 : index
    %87 = vector.load %arg3[%c0_23, %c4_24] : memref<8x9xf32, #tpu.memory_space<vmem>>, vector<8x1xf32>
    %88 = vector.broadcast %87 : vector<8x1xf32> to vector<8x256xf32>
    %89 = arith.addf %84, %88 : vector<8x256xf32>
    %90 = arith.mulf %4, %89 : vector<8x256xf32>
    %91 = arith.maximumf %72, %90 : vector<8x256xf32>
    %92 = arith.subf %72, %91 : vector<8x256xf32>
    %93 = math.exp %92 : vector<8x256xf32>
    %94 = arith.subf %90, %91 : vector<8x256xf32>
    %95 = math.exp %94 : vector<8x256xf32>
    %96 = arith.mulf %78, %93 : vector<8x256xf32>
    %97 = arith.addf %96, %95 : vector<8x256xf32>
    %98 = arith.mulf %81, %93 : vector<8x256xf32>
    %99 = arith.mulf %95, %86 : vector<8x256xf32>
    %100 = arith.addf %98, %99 : vector<8x256xf32>
    %c255_i32 = arith.constant 255 : i32
    %101 = tpu.dynamic_rotate %5 by %c255_i32 dim 1 : vector<8x256xf32>, i32 -> vector<8x256xf32>
    %c255_i32_25 = arith.constant 255 : i32
    %102 = tpu.dynamic_rotate %6 by %c255_i32_25 dim 1 : vector<8x256xf32>, i32 -> vector<8x256xf32>
    %c5 = arith.constant 5 : index
    %c0_26 = arith.constant 0 : index
    %103 = vector.load %arg4[%c5, %c0_26] : memref<9x256xf32, #tpu.memory_space<vmem>>, vector<1x256xf32>
    %104 = vector.broadcast %103 : vector<1x256xf32> to vector<8x256xf32>
    %105 = arith.mulf %101, %104 : vector<8x256xf32>
    %106 = vector.broadcast %103 : vector<1x256xf32> to vector<8x256xf32>
    %107 = arith.mulf %102, %106 : vector<8x256xf32>
    %c0_27 = arith.constant 0 : index
    %c5_28 = arith.constant 5 : index
    %108 = vector.load %arg3[%c0_27, %c5_28] : memref<8x9xf32, #tpu.memory_space<vmem>>, vector<8x1xf32>
    %109 = vector.broadcast %108 : vector<8x1xf32> to vector<8x256xf32>
    %110 = arith.addf %105, %109 : vector<8x256xf32>
    %111 = arith.mulf %4, %110 : vector<8x256xf32>
    %112 = arith.maximumf %91, %111 : vector<8x256xf32>
    %113 = arith.subf %91, %112 : vector<8x256xf32>
    %114 = math.exp %113 : vector<8x256xf32>
    %115 = arith.subf %111, %112 : vector<8x256xf32>
    %116 = math.exp %115 : vector<8x256xf32>
    %117 = arith.mulf %97, %114 : vector<8x256xf32>
    %118 = arith.addf %117, %116 : vector<8x256xf32>
    %119 = arith.mulf %100, %114 : vector<8x256xf32>
    %120 = arith.mulf %116, %107 : vector<8x256xf32>
    %121 = arith.addf %119, %120 : vector<8x256xf32>
    %c241_i32 = arith.constant 241 : i32
    %122 = tpu.dynamic_rotate %5 by %c241_i32 dim 1 : vector<8x256xf32>, i32 -> vector<8x256xf32>
    %c241_i32_29 = arith.constant 241 : i32
    %123 = tpu.dynamic_rotate %6 by %c241_i32_29 dim 1 : vector<8x256xf32>, i32 -> vector<8x256xf32>
    %c6 = arith.constant 6 : index
    %c0_30 = arith.constant 0 : index
    %124 = vector.load %arg4[%c6, %c0_30] : memref<9x256xf32, #tpu.memory_space<vmem>>, vector<1x256xf32>
    %125 = vector.broadcast %124 : vector<1x256xf32> to vector<8x256xf32>
    %126 = arith.mulf %122, %125 : vector<8x256xf32>
    %127 = vector.broadcast %124 : vector<1x256xf32> to vector<8x256xf32>
    %128 = arith.mulf %123, %127 : vector<8x256xf32>
    %c0_31 = arith.constant 0 : index
    %c6_32 = arith.constant 6 : index
    %129 = vector.load %arg3[%c0_31, %c6_32] : memref<8x9xf32, #tpu.memory_space<vmem>>, vector<8x1xf32>
    %130 = vector.broadcast %129 : vector<8x1xf32> to vector<8x256xf32>
    %131 = arith.addf %126, %130 : vector<8x256xf32>
    %132 = arith.mulf %4, %131 : vector<8x256xf32>
    %133 = arith.maximumf %112, %132 : vector<8x256xf32>
    %134 = arith.subf %112, %133 : vector<8x256xf32>
    %135 = math.exp %134 : vector<8x256xf32>
    %136 = arith.subf %132, %133 : vector<8x256xf32>
    %137 = math.exp %136 : vector<8x256xf32>
    %138 = arith.mulf %118, %135 : vector<8x256xf32>
    %139 = arith.addf %138, %137 : vector<8x256xf32>
    %140 = arith.mulf %121, %135 : vector<8x256xf32>
    %141 = arith.mulf %137, %128 : vector<8x256xf32>
    %142 = arith.addf %140, %141 : vector<8x256xf32>
    %c240_i32 = arith.constant 240 : i32
    %143 = tpu.dynamic_rotate %5 by %c240_i32 dim 1 : vector<8x256xf32>, i32 -> vector<8x256xf32>
    %c240_i32_33 = arith.constant 240 : i32
    %144 = tpu.dynamic_rotate %6 by %c240_i32_33 dim 1 : vector<8x256xf32>, i32 -> vector<8x256xf32>
    %c7 = arith.constant 7 : index
    %c0_34 = arith.constant 0 : index
    %145 = vector.load %arg4[%c7, %c0_34] : memref<9x256xf32, #tpu.memory_space<vmem>>, vector<1x256xf32>
    %146 = vector.broadcast %145 : vector<1x256xf32> to vector<8x256xf32>
    %147 = arith.mulf %143, %146 : vector<8x256xf32>
    %148 = vector.broadcast %145 : vector<1x256xf32> to vector<8x256xf32>
    %149 = arith.mulf %144, %148 : vector<8x256xf32>
    %c0_35 = arith.constant 0 : index
    %c7_36 = arith.constant 7 : index
    %150 = vector.load %arg3[%c0_35, %c7_36] : memref<8x9xf32, #tpu.memory_space<vmem>>, vector<8x1xf32>
    %151 = vector.broadcast %150 : vector<8x1xf32> to vector<8x256xf32>
    %152 = arith.addf %147, %151 : vector<8x256xf32>
    %153 = arith.mulf %4, %152 : vector<8x256xf32>
    %154 = arith.maximumf %133, %153 : vector<8x256xf32>
    %155 = arith.subf %133, %154 : vector<8x256xf32>
    %156 = math.exp %155 : vector<8x256xf32>
    %157 = arith.subf %153, %154 : vector<8x256xf32>
    %158 = math.exp %157 : vector<8x256xf32>
    %159 = arith.mulf %139, %156 : vector<8x256xf32>
    %160 = arith.addf %159, %158 : vector<8x256xf32>
    %161 = arith.mulf %142, %156 : vector<8x256xf32>
    %162 = arith.mulf %158, %149 : vector<8x256xf32>
    %163 = arith.addf %161, %162 : vector<8x256xf32>
    %c239_i32 = arith.constant 239 : i32
    %164 = tpu.dynamic_rotate %5 by %c239_i32 dim 1 : vector<8x256xf32>, i32 -> vector<8x256xf32>
    %c239_i32_37 = arith.constant 239 : i32
    %165 = tpu.dynamic_rotate %6 by %c239_i32_37 dim 1 : vector<8x256xf32>, i32 -> vector<8x256xf32>
    %c8 = arith.constant 8 : index
    %c0_38 = arith.constant 0 : index
    %166 = vector.load %arg4[%c8, %c0_38] : memref<9x256xf32, #tpu.memory_space<vmem>>, vector<1x256xf32>
    %167 = vector.broadcast %166 : vector<1x256xf32> to vector<8x256xf32>
    %168 = arith.mulf %164, %167 : vector<8x256xf32>
    %169 = vector.broadcast %166 : vector<1x256xf32> to vector<8x256xf32>
    %170 = arith.mulf %165, %169 : vector<8x256xf32>
    %c0_39 = arith.constant 0 : index
    %c8_40 = arith.constant 8 : index
    %171 = vector.load %arg3[%c0_39, %c8_40] : memref<8x9xf32, #tpu.memory_space<vmem>>, vector<8x1xf32>
    %172 = vector.broadcast %171 : vector<8x1xf32> to vector<8x256xf32>
    %173 = arith.addf %168, %172 : vector<8x256xf32>
    %174 = arith.mulf %4, %173 : vector<8x256xf32>
    %175 = arith.maximumf %154, %174 : vector<8x256xf32>
    %176 = arith.subf %154, %175 : vector<8x256xf32>
    %177 = math.exp %176 : vector<8x256xf32>
    %178 = arith.subf %174, %175 : vector<8x256xf32>
    %179 = math.exp %178 : vector<8x256xf32>
    %180 = arith.mulf %160, %177 : vector<8x256xf32>
    %181 = arith.addf %180, %179 : vector<8x256xf32>
    %182 = arith.mulf %163, %177 : vector<8x256xf32>
    %183 = arith.mulf %179, %170 : vector<8x256xf32>
    %184 = arith.addf %182, %183 : vector<8x256xf32>
    %185 = tpu.reciprocal %181 {approx = true} : vector<8x256xf32> -> vector<8x256xf32>
    %186 = arith.mulf %184, %185 : vector<8x256xf32>
    %c0_41 = arith.constant 0 : index
    %c0_42 = arith.constant 0 : index
    %c0_43 = arith.constant 0 : index
    %187 = vector.load %arg5[%c0_41, %c0_42, %c0_43] : memref<1x8x256xf32, #tpu.memory_space<vmem>>, vector<1x8x256xf32>
    %188 = vector.shape_cast %187 : vector<1x8x256xf32> to vector<8x256xf32>
    %189 = vector.shape_cast %186 : vector<8x256xf32> to vector<1x8x256xf32>
    tpu.vector_store %arg5[%c0_41, %c0_42, %c0_43], %189 {strides = array<i32>} : memref<1x8x256xf32, #tpu.memory_space<vmem>>, vector<1x8x256xf32>,
    %cst_44 = arith.constant dense<0.000000e+00> : vector<8xf32>
    %190 = vector.multi_reduction <add>, %186, %cst_44 [1] : vector<8x256xf32> to vector<8xf32>
    %191 = vector.shape_cast %190 : vector<8xf32> to vector<8x1xf32>
    %c0_45 = arith.constant 0 : index
    %c0_46 = arith.constant 0 : index
    %c0_47 = arith.constant 0 : index
    %192 = vector.load %arg6[%c0_45, %c0_46, %c0_47] : memref<1x8x1xf32, #tpu.memory_space<vmem>>, vector<1x8x1xf32>
    %193 = vector.shape_cast %192 : vector<1x8x1xf32> to vector<8x1xf32>
    %194 = vector.shape_cast %191 : vector<8x1xf32> to vector<1x8x1xf32>
    tpu.vector_store %arg6[%c0_45, %c0_46, %c0_47], %194 {strides = array<i32>} : memref<1x8x1xf32, #tpu.memory_space<vmem>>, vector<1x8x1xf32>,
    %195 = arith.mulf %186, %186 : vector<8x256xf32>
    %cst_48 = arith.constant dense<0.000000e+00> : vector<8xf32>
    %196 = vector.multi_reduction <add>, %195, %cst_48 [1] : vector<8x256xf32> to vector<8xf32>
    %197 = vector.shape_cast %196 : vector<8xf32> to vector<8x1xf32>
    %c0_49 = arith.constant 0 : index
    %c0_50 = arith.constant 0 : index
    %c0_51 = arith.constant 0 : index
    %198 = vector.load %arg7[%c0_49, %c0_50, %c0_51] : memref<1x8x1xf32, #tpu.memory_space<vmem>>, vector<1x8x1xf32>
    %199 = vector.shape_cast %198 : vector<1x8x1xf32> to vector<8x1xf32>
    %200 = vector.shape_cast %197 : vector<8x1xf32> to vector<1x8x1xf32>
    tpu.vector_store %arg7[%c0_49, %c0_50, %c0_51], %200 {strides = array<i32>} : memref<1x8x1xf32, #tpu.memory_space<vmem>>, vector<1x8x1xf32>,
    return
  }
  func.func @transform_0(%arg0: i32) -> (i32, i32, i32) {
    %c0_i32 = arith.constant 0 : i32
    %c0_i32_0 = arith.constant 0 : i32
    %c0_i32_1 = arith.constant 0 : i32
    return %arg0, %c0_i32, %c0_i32_0 : i32, i32, i32
  }
  func.func @transform_1(%arg0: i32) -> (i32, i32) {
    %c0_i32 = arith.constant 0 : i32
    %c0_i32_0 = arith.constant 0 : i32
    %c0_i32_1 = arith.constant 0 : i32
    return %c0_i32, %c0_i32_0 : i32, i32
  }
  func.func @transform_2(%arg0: i32) -> (i32, i32) {
    %c0_i32 = arith.constant 0 : i32
    %c0_i32_0 = arith.constant 0 : i32
    %c0_i32_1 = arith.constant 0 : i32
    return %c0_i32, %c0_i32_0 : i32, i32
  }
  func.func @transform_3(%arg0: i32) -> (i32, i32) {
    %c0_i32 = arith.constant 0 : i32
    %c0_i32_0 = arith.constant 0 : i32
    %c0_i32_1 = arith.constant 0 : i32
    return %c0_i32, %c0_i32_0 : i32, i32
  }
  func.func @transform_4(%arg0: i32) -> (i32, i32, i32) {
    %c0_i32 = arith.constant 0 : i32
    %c0_i32_0 = arith.constant 0 : i32
    %c0_i32_1 = arith.constant 0 : i32
    return %arg0, %c0_i32, %c0_i32_0 : i32, i32, i32
  }
  func.func @transform_5(%arg0: i32) -> (i32, i32, i32) {
    %c0_i32 = arith.constant 0 : i32
    %c0_i32_0 = arith.constant 0 : i32
    %c0_i32_1 = arith.constant 0 : i32
    return %arg0, %c0_i32, %c0_i32_0 : i32, i32, i32
  }
  func.func @transform_6(%arg0: i32) -> (i32, i32, i32) {
    %c0_i32 = arith.constant 0 : i32
    %c0_i32_0 = arith.constant 0 : i32
    %c0_i32_1 = arith.constant 0 : i32
    return %arg0, %c0_i32, %c0_i32_0 : i32, i32, i32
  }
}

</mosaic_0001>

<bundles_post_ra>
// kernel: tpu_custom_call.1
= control target key start
LH: loop header
LB: loop body
LE: loop exit
PB: predicated region body
PF: predicated region fallthrough
CT: control target
= control target key end

     0   :  { %12 = vsyncpa [#allocation3], 0  ;;  %s1987_s0 = inlined_call_operand.vmem [shape: bf16[2,4,256], index: 0, kind: input, shape index: {}]   ;;  %s1988_s1 = inlined_call_operand.vmem [shape: bf16[24,4], index: 1, kind: input, shape index: {}]   ;;  %s1989_s2 = inlined_call_operand.vmem [shape: f32[8,9], index: 2, kind: input, shape index: {}]   ;;  %s1990_s3 = inlined_call_operand.hbm [shape: f32[9,256], index: 3, kind: input, shape index: {}]   ;;  %s1991_s4 = inlined_call_operand.hbm [shape: f32[2,8,256], index: 4, kind: output, shape index: {0}]   ;;  %s1992_s5 = inlined_call_operand.vmem [shape: f32[2,8,1], index: 5, kind: output, shape index: {1}]   ;;  %s1993_s6 = inlined_call_operand.vmem [shape: f32[2,8,1], index: 6, kind: output, shape index: {2}]  }
   0x1   :  { %13 = vsyncpa [#allocation4], 0 }
   0x2   :  { %15 = vsyncpa [#allocation4 + $0x1], 0  ;;  %s1386_s21 = smov 0   ;;  %s1388_s22 = smov 0  }
   0x3   :  { %s1390_s23 = smov 0   ;;  %s1392_s24 = smov 0  }
   0x4 LB: > { %s1407_s25 = sadd.s32 4294967295, %s1328_s24   ;;  %s1060_s26 = sadd.s32 4294967294, %s1328_s24   ;;  %s1328_s24 = sphi %s1392_s24, %s2009_s24   ;;  %s1324_s23 = sphi %s1390_s23, %s2008_s23   ;;  %s1320_s22 = sphi %s1388_s22, %s2007_s22   ;;  %s1316_s21 = sphi %s1386_s21, %s2006_s21  }
   0x5   : > { %s1411_s27 = sadd.s32 1, %s1328_s24   ;;  %s117_s28 = sadd.s32 1, %s1324_s23 }
   0x6   : > { %s114_s29 = ssub.s32 %s1328_s24, %s1411_s27  ;;  %p127_p0 = scmp.ne.s32.totalorder %s1324_s23, %s1320_s22 }
   0x7   : > { %p115_p1 = scmp.eq.s32.totalorder %s114_s29, 0  ;;  %p128_p2 = scmp.eq.s32.totalorder %s1407_s25, 1 }
   0x8   : > { %p133_p3 = scmp.ne.s32.totalorder %s1320_s22, %s1316_s21  ;;  %p134_p4 = scmp.eq.s32.totalorder %s1060_s26, 1 }
   0x9   : > { %s1422_s30 = scalar_select %p115_p1, %s1324_s23, %s117_s28  }
   0xa   : > { %p1424_p5 = por %p128_p2, %p127_p0  ;;  %p1428_p6 = por %p134_p4, %p133_p3 }
   0xb   : > { %p1061_p7 = scmp.ge.s32.totalorder %s1328_s24, 1  ;;  %p193_p8 = scmp.lt.s32.totalorder %s1328_s24, 3 }
   0xc   : > { %s1997_s7 = scalar_select %p1424_p5, 1, 0 }
   0xd   : > { %s1998_s8 = scalar_select %p1428_p6, 1, 0 }
   0xe   : > { %p1994_p9 = scmp.eq.s32.totalorder %s1407_s25, 0  ;;  %p1435_p10 = pnand %p1061_p7, %p193_p8 }
   0xf   : > { %s1330_s10 = smov [#allocation2]   ;;  %s1234_s15 = scalar_lea.hbm %s1990_s3, 512 }
  0x10   : > { %s1999_s9 = scalar_select %p1435_p10, 1, 0 }
  0x11   : > { %s211_s11 = sshll.u32 %s1330_s10, 4  ;;  %p1092_p11 = pneg %p1435_p10  ;;  %s212_s11 = int_to_ptr.vmem [resolvable:$true] %s211_s11 }
  0x12   : > { %p1235_p13 = scmp.ne.s32.totalorder %s1990_s3, %s1234_s15  ;;  %p1241_p3 = scmp.lt.u32.totalorder %s1234_s15, %s1990_s3 }
  0x13   : > { %p1443_p12 = pnand %p1994_p9, %p1092_p11 }
  0x15   : > { %p1236_p0 = pneg %p1443_p12 }
  0x17   : > { %p1237_p1 = pnand %p1236_p0, %p1235_p13 }
  0x19   : > { %p1238_p2 = pneg %p1237_p1 }
  0x1b   : > { %p1243_p4 = pnand %p1241_p3, %p1238_p2 }
  0x1d   : > { %1246 = shalt.err (!%p1243_p4)
}
  0x1e   : > { %s1247_s20 = scalar_lea.vmem %s212_s11, 512  ;;  %p1255_p9 = scmp.lt.s32.totalorder %s212_s11, %s212_s11 }
  0x1f   : > { %p1248_p7 = scmp.ne.s32.totalorder %s212_s11, %s1247_s20  ;;  %p1256_p6 = scmp.lt.s32.totalorder %s1247_s20, %s1247_s20 }
  0x21   : > { %p1250_p8 = pnand %p1248_p7, %p1236_p0  ;;  %p1257_p5 = por %p1256_p6, %p1255_p9 }
  0x23   : > { %p1251_p11 = pneg %p1250_p8 }
  0x25   : > { %p1258_p10 = pnand %p1257_p5, %p1251_p11 }
  0x27   : > { %1261 = shalt.err (!%p1258_p10)
}
  0x28   : > { %s1331_s26 = smov 256   ;;  %s1332_s28 = smov 16  }
  0x29   : > { %1095 = dma.hbm_to_vmem [thread:$0]  (!%p1443_p12), %s1990_s3, 512, %s212_s11, [#allocation3], %s1331_s26, %s1331_s26, %s1332_s28  }
  0x2a   : > { %p2001_p13 = scmp.ne.s32.totalorder %s1999_s9, 0 }
  0x2b   : > { %p2002_p1 = scmp.eq.s32.totalorder (!%p2001_p13), %s1407_s25, 0 }
  0x2c   : > { %235 = sbr.rel (%p2001_p13) target bundleno = 650 (0x28a), region = 36 }
  0x33   : > { %1307 = dma.done.wait (%p2002_p1), [#allocation3], 512   ;;  %p2003_p0 = pmov %p2002_p1 }
  0x34   : > { %p273_p5 = scmp.lt.s32.totalorder %s1407_s25, 1  ;;  %v1333_v0 = vmov 0   ;;  %v1334_v1 = vmov 2   ;;  %vm315_vm0 = vcmask 1041408   ;;  %v1480_v5 = vld [vmem:[%s1989_s2] sm:$0xff]  ;;  %vm308_vm1 = vcmask 31744  }
  0x35   : > { %1309 = vsyncadd (%p2003_p0), [#allocation3], 4294966784  ;;  %354 = vmatprep.mubr.bf16.mxu0 %v1333_v0  ;;  %364 = vmatprep.mubr.bf16.mxu1 %v1333_v0  ;;  %v1164_v6 = vld [vmem:[%s1988_s1] sm:$0xff]   ;;  %v1165_v7 = vld [vmem:[%s1988_s1 + $0x8] ss:$0 sps:$4 sm:$0xff]   ;;  %v1335_v8 = vmov 1   ;;  %v377_v16 = vlaneseq }
  0x36   : > { %s1471_s12 = scalar_select %p273_p5, %s1407_s25, 1  ;;  %1155 = vset.pattern.permute.xlu0 %v1333_v0  ;;  %1157 = vset.pattern.permute.xlu1 %v1334_v1  ;;  %v1336_v9 = vmov 5   ;;  %v1337_v10 = vmov 3   ;;  %v1338_v11 = vmov 6   ;;  %v1339_v12 = vmov 4  }
  0x37   : > { %407 = vperm.xlu0 %1155, %v1480_v5   ;;  %505 = vperm.xlu1 %1157, %v1480_v5   ;;  %v1340_v13 = vmov 7   ;;  %v391_v17 = vshrl.u32 %v377_v16, 7  ;;  %v599_v21 = vld [vmem:[#allocation2 + $0x4] ss:$8 sm:$0x3]  ;;  %s1341_s26 = smov 16  }
  0x38   : > { %s1082_s9 = sshll.u32 %s1471_s12, 2  ;;  %s1342_s28 = smov 17   ;;  %v1348_v39 = vmov 8   ;;  %v1577_v46 = vand.u32 127, %v377_v16 }
  0x39   : > { %s277_s14 = scalar_lea.vmem %s1987_s0, %s1082_s9  ;;  %v1502_v19 = vsub.s32 0, %v391_v17  ;;  %v1504_v20 = vsub.s32 1, %v391_v17  ;;  %s1343_s29 = smov 15   ;;  %v388_v48 = vld [vmem:[#allocation2] ss:$8 sm:$0x3] }
  0x3a   : > { %v1073_v2 = vld.sshfl [vmem:[%s277_s14] sm:$0x33 pattern:$0x76325410]  ;;  %s1344_s10 = smov 1   ;;  %s1345_s9 = smov 127  }
  0x3b   : > { %v307_v3 = vcombine.high %v1073_v2, %v1073_v2  ;;  %v317_v4 = vsel %vm315_vm0, %v1073_v2, 0  ;;  %1156 = vset.pattern.permute.xlu0 %v1335_v8  ;;  %1160 = vset.pattern.permute.xlu1 %v1336_v9  ;;  %v1507_v22 = vrot.slane %v599_v21, %v1502_v19  ;;  %v1512_v25 = vrot.slane %v599_v21, %v1504_v20  ;;  %s1346_s11 = smov 113   ;;  %s1347_s13 = smov 112   ;;  %v428_v52 = vld [vmem:[#allocation2 + $0x1] ss:$8 sm:$0x3] }
  0x3c   : > { %445 = vperm.xlu0 %1156, %v1480_v5   ;;  %678 = vperm.xlu1 %1160, %v1480_v5   ;;  %s1349_s14 = smov 111   ;;  %vm379_vm2 = vcmp.lt.s32.totalorder %v1577_v46, 17  ;;  %v1583_v50 = vrot.slane %v388_v48, %v1502_v19  ;;  %v1586_v51 = vrot.slane %v388_v48, %v1504_v20  ;;  %vm418_vm3 = vcmp.lt.s32.totalorder %v1577_v46, 16  ;;  %v488_v61 = vld [vmem:[#allocation2 + $0x2] ss:$8 sm:$0x3] }
  0x3d   : > { %1074 = vmatprep.subr.msk.bf16.mxu0 %vm315_vm0, %v307_v3  ;;  %1084 = vmatprep.subr.msk.bf16.mxu1 %vm315_vm0, %v307_v3  ;;  %v1596_v59 = vrot.slane %v428_v52, %v1502_v19  ;;  %v1599_v60 = vrot.slane %v428_v52, %v1504_v20  ;;  %vm478_vm4 = vcmp.lt.s32.totalorder %v1577_v46, 15  ;;  %v550_v8 = vld [vmem:[#allocation2 + $0x3] ss:$8 sm:$0x3]  ;;  %vm540_vm5 = vcmp.lt.s32.totalorder %v1577_v46, 1  ;;  %s258_s15 = sand.u32 1, %s1320_s22  }
  0x3e   : > { %323 = vmatpush1.bf16.msra.mxu0 %v317_v4  ;;  %1085 = vmatpush1.bf16.msra.mxu1 %v317_v4  ;;  %vm651_vm6 = vcmp.lt.s32.totalorder %v1577_v46, 127  ;;  %vm713_vm7 = vcmp.lt.s32.totalorder %v1577_v46, 113  ;;  %vm775_vm8 = vcmp.lt.s32.totalorder %v1577_v46, 112  ;;  %vm837_vm9 = vcmp.lt.s32.totalorder %v1577_v46, 111  ;;  %s1066_s16 = sshll.u32 %s258_s15, 4  ;;  %s1083_s18 = sshll.u32 %s1407_s25, 8 }
  0x3f   : > { %s260_s17 = scalar_lea.vmem [#allocation5], %s1066_s16  ;;  %p2004_p9 = scmp.ne.s32.totalorder %s1997_s7, 0 }
  0x40   : > { %1158 = vset.pattern.permute.xlu0 %v1337_v10  ;;  %1161 = vset.pattern.permute.xlu1 %v1338_v11 }
  0x41   : > { %1075 = vmatmul.mubr.msk.bf16.vlgmr.msra.gmra.mrb[0].mxu0 %vm308_vm1, %v1164_v6  ;;  %1076 = vmatmul.mubr.msk.bf16.vlgmr.msra.gmra.mrb[0].mxu1 %vm308_vm1, %v1165_v7  ;;  %v1613_v6 = vrot.slane %v488_v61, %v1502_v19  ;;  %v1616_v7 = vrot.slane %v488_v61, %v1504_v20 }
  0x42   : > { %567 = vperm.xlu0 %1158, %v1480_v5   ;;  %740 = vperm.xlu1 %1161, %v1480_v5  }
  0x46   : > { %1159 = vset.pattern.permute.xlu0 %v1339_v12 }
  0x47   : > { %616 = vperm.xlu0 %1159, %v1480_v5  }
  0x4b   : > { %1162 = vset.pattern.permute.xlu0 %v1340_v13  ;;  %v661_v13 = vld [vmem:[#allocation2 + $0x5] ss:$8 sm:$0x3] }
  0x4c   : > { %v1666_v48 = vrot.slane %v661_v13, %v1504_v20 }
  0xb6   : > { %v1495_v14 = vpop.permute.xlu0 %407  ;;  %v506_v40 = vpop.permute.xlu1 %505 }
  0xbb   : > { %v1497_v15 = vpop.permute.xlu0 %445  ;;  %v1570_v41 = vpop.permute.xlu1 %678 }
  0xc1   : > { %v1500_v18 = vpop.permute.xlu0 %567  ;;  %v1572_v42 = vpop.permute.xlu1 %740 }
  0xc6   : > { %v617_v23 = vpop.permute.xlu0 %616 }
 0x114   : > { %v1509_v24 = vpop.f32.mrb[0].mxu0  ;;  %v1514_v26 = vpop.f32.mrb[0].mxu1 }
 0x115   : > { %v1516_v27 = vpop.f32.mrb[1].mxu0  ;;  %v1518_v28 = vpop.f32.mrb[1].mxu1  ;;  %v1620_v9 = vmul.f32 %v1507_v22, %v1514_v26 }
 0x116   : > { %v360_v29 = vpop.f32.mrb[2].mxu0  ;;  %v370_v30 = vpop.f32.mrb[2].mxu1 }
 0x117   : > { %414 = vrot.lane.b32.xlu0 %v360_v29, %s1341_s26  ;;  %373 = vrot.lane.b32.xlu1 %v360_v29, %s1342_s28  ;;  %v362_v31 = vpop.f32.mrb[3].mxu0  ;;  %v611_v32 = vmul.f32 %v1507_v22, %v360_v29  ;;  %v371_v33 = vpop.f32.mrb[3].mxu1  ;;  %v1646_v30 = vrot.slane %v550_v8, %v1502_v19 }
 0x118   : > { %v612_v34 = vmul.f32 %v1512_v25, %v362_v31 }
 0x119   : > { %v619_v35 = vadd.f32 %v617_v23, %v611_v32  ;;  %v1653_v32 = vrot.slane %v661_v13, %v1502_v19 }
 0x11a   : > { %v620_v36 = vadd.f32 %v617_v23, %v612_v34 }
 0x11b   : > { %v1525_v37 = vmul.f32 %v619_v35, %v1509_v24  ;;  %474 = vrot.lane.b32.xlu0 %v360_v29, %s1343_s29  ;;  %536 = vrot.lane.b32.xlu1 %v360_v29, %s1344_s10 }
 0x11c   : > { %v1530_v38 = vmul.f32 %v620_v36, %v1516_v27 }
 0x11f   : > { %802 = vperm.xlu0 %1162, %v1480_v5   ;;  %647 = vrot.lane.b32.xlu1 %v360_v29, %s1345_s9 }
 0x123   : > { %709 = vrot.lane.b32.xlu0 %v360_v29, %s1346_s11  ;;  %771 = vrot.lane.b32.xlu1 %v360_v29, %s1347_s13 }
 0x124   : > { %1163 = vset.pattern.permute.xlu0 %v1348_v39 }
 0x127   : > { %649 = vrot.lane.b32.xlu0 %v362_v31, %s1345_s9  ;;  %375 = vrot.lane.b32.xlu1 %v362_v31, %s1342_s28 }
 0x12b   : > { %864 = vperm.xlu0 %1163, %v1480_v5   ;;  %416 = vrot.lane.b32.xlu1 %v362_v31, %s1341_s26 }
 0x12f   : > { %382 = vrot.lane.b32.xlu0 %v1514_v26, %s1342_s28  ;;  %476 = vrot.lane.b32.xlu1 %v362_v31, %s1343_s29 }
 0x133   : > { %421 = vrot.lane.b32.xlu0 %v1514_v26, %s1341_s26  ;;  %538 = vrot.lane.b32.xlu1 %v362_v31, %s1344_s10 }
 0x137   : > { %481 = vrot.lane.b32.xlu0 %v1514_v26, %s1343_s29  ;;  %833 = vrot.lane.b32.xlu1 %v360_v29, %s1349_s14  ;;  %v723_v29 = vld [vmem:[#allocation2 + $0x6] ss:$8 sm:$0x3] }
 0x13b   : > { %543 = vrot.lane.b32.xlu0 %v1514_v26, %s1344_s10  ;;  %384 = vrot.lane.b32.xlu1 %v1518_v28, %s1342_s28  ;;  %s935_s28 = sshll.u32 %s260_s17, 4  ;;  %s936_s28 = int_to_ptr.vmem [resolvable:$true] %s935_s28 }
 0x13f   : > { %654 = vrot.lane.b32.xlu0 %v1514_v26, %s1345_s9  ;;  %711 = vrot.lane.b32.xlu1 %v362_v31, %s1346_s11 }
 0x143   : > { %716 = vrot.lane.b32.xlu0 %v1514_v26, %s1346_s11  ;;  %773 = vrot.lane.b32.xlu1 %v362_v31, %s1347_s13 }
 0x147   : > { %778 = vrot.lane.b32.xlu0 %v1514_v26, %s1347_s13  ;;  %835 = vrot.lane.b32.xlu1 %v362_v31, %s1349_s14  ;;  %v1649_v31 = vrot.slane %v550_v8, %v1504_v20 }
 0x14b   : > { %840 = vrot.lane.b32.xlu0 %v1514_v26, %s1349_s14  ;;  %423 = vrot.lane.b32.xlu1 %v1518_v28, %s1341_s26  ;;  %s1944_s26 = scalar_lea.hbm %s1991_s4, %s1083_s18 }
 0x14f   : > { %483 = vrot.lane.b32.xlu1 %v1518_v28, %s1343_s29  ;;  %s913_s29 = scalar_lea.sflag [#allocation4], %s258_s15 }
 0x153   : > { %545 = vrot.lane.b32.xlu1 %v1518_v28, %s1344_s10  ;;  %s1262_s10 = scalar_lea.vmem %s936_s28, 256 }
 0x154   : > { %p1263_p6 = scmp.ne.s32.totalorder %s936_s28, %s1262_s10 }
 0x156   : > { %p1264_p10 = pnand %p1263_p6, %p2004_p9 }
 0x157   : > { %656 = vrot.lane.b32.xlu1 %v1518_v28, %s1345_s9  ;;  %s1350_s9 = smov [#allocation5]  }
 0x158   : > { %p1265_p12 = pneg %p1264_p10 }
 0x15b   : > { %718 = vrot.lane.b32.xlu1 %v1518_v28, %s1346_s11  ;;  %s1266_s11 = sshll.u32 %s1350_s9, 4  ;;  %s1267_s11 = int_to_ptr.vmem [resolvable:$false] %s1266_s11 }
 0x15c   : > { %p1269_p2 = scmp.lt.s32.totalorder %s936_s28, %s1267_s11 }
 0x15f   : > { %780 = vrot.lane.b32.xlu1 %v1518_v28, %s1347_s13  ;;  %s1268_s13 = scalar_lea.vmem %s1267_s11, 512 }
 0x160   : > { %p1270_p3 = scmp.lt.s32.totalorder %s1268_s13, %s1262_s10 }
 0x162   : > { %p1271_p4 = por %p1270_p3, %p1269_p2 }
 0x163   : > { %842 = vrot.lane.b32.xlu1 %v1518_v28, %s1349_s14 }
 0x164   : > { %p1272_p7 = pnand %p1271_p4, %p1265_p12 }
 0x189   : > { %v374_v43 = vpop.permute.xlu1 %373  ;;  %v415_v47 = vpop.permute.xlu0 %414 }
 0x18d   : > { %v537_v44 = vpop.permute.xlu1 %536  ;;  %v475_v54 = vpop.permute.xlu0 %474 }
 0x191   : > { %v1574_v45 = vpop.permute.xlu1 %647 }
 0x195   : > { %v1579_v49 = vpop.permute.xlu1 %771 }
 0x199   : > { %v376_v53 = vpop.permute.xlu1 %375 }
 0x19a   : > { %v380_v55 = vsel %vm379_vm2, %v374_v43, %v376_v53  ;;  %v381_v56 = vsel %vm379_vm2, %v376_v53, %v374_v43  ;;  %v1669_v53 = vrot.slane %v723_v29, %v1502_v19 }
 0x19b   : > { %v400_v57 = vmul.f32 %v1583_v50, %v381_v56  ;;  %v401_v58 = vmul.f32 %v1586_v51, %v380_v55 }
 0x19d   : > { %v417_v62 = vpop.permute.xlu1 %416  ;;  %v410_v63 = vadd.f32 %v1495_v14, %v400_v57  ;;  %v411_v0 = vadd.f32 %v1495_v14, %v401_v58  ;;  %v1627_v14 = vmul.f32 %v1512_v25, %v1518_v28 }
 0x19e   : > { %v419_v1 = vsel %vm418_vm3, %v415_v47, %v417_v62  ;;  %v420_v2 = vsel %vm418_vm3, %v417_v62, %v415_v47  ;;  %v1608_v3 = vpop.permute.xlu0 %802 }
 0x19f   : > { %v440_v4 = vmul.f32 %v1596_v59, %v420_v2  ;;  %v441_v5 = vmul.f32 %v1599_v60, %v419_v1  ;;  %v1630_v16 = vmul.f32 %v410_v63, %v1509_v24  ;;  %v1633_v17 = vmul.f32 %v411_v0, %v1516_v27 }
 0x1a1   : > { %v448_v10 = vadd.f32 %v1497_v15, %v440_v4  ;;  %v449_v11 = vadd.f32 %v1497_v15, %v441_v5  ;;  %v477_v12 = vpop.permute.xlu1 %476 }
 0x1a2   : > { %v479_v21 = vsel %vm478_vm4, %v475_v54, %v477_v12  ;;  %v480_v15 = vsel %vm478_vm4, %v477_v12, %v475_v54  ;;  %v1639_v22 = vpop.permute.xlu0 %709 }
 0x1a3   : > { %v450_v23 = vmul.f32 %v448_v10, %v1509_v24  ;;  %v451_v26 = vmul.f32 %v449_v11, %v1516_v27  ;;  %v500_v25 = vmul.f32 %v1613_v6, %v480_v15  ;;  %v501_v28 = vmul.f32 %v1616_v7, %v479_v21 }
 0x1a4   : > { %v1691_v10 = vrot.slane %v723_v29, %v1504_v20 }
 0x1a5   : > { %v1656_v33 = vmax.f32 %v1630_v16, %v450_v23  ;;  %v1659_v34 = vmax.f32 %v1633_v17, %v451_v26  ;;  %v508_v35 = vadd.f32 %v506_v40, %v500_v25  ;;  %v509_v36 = vadd.f32 %v506_v40, %v501_v28  ;;  %v539_v39 = vpop.permute.xlu1 %538 }
 0x1a6   : > { %v541_v43 = vsel %vm540_vm5, %v537_v44, %v539_v39  ;;  %v542_v47 = vsel %vm540_vm5, %v539_v39, %v537_v44  ;;  %v650_v52 = vpop.permute.xlu0 %649 }
 0x1a7   : > { %v460_v54 = vsub.f32 %v450_v23, %v1656_v33  ;;  %v461_v55 = vsub.f32 %v451_v26, %v1659_v34  ;;  %v510_v40 = vmul.f32 %v508_v35, %v1509_v24  ;;  %v511_v56 = vmul.f32 %v509_v36, %v1516_v27  ;;  %v785_v26 = vld [vmem:[#allocation2 + $0x7] ss:$8 sm:$0x3] }
 0x1a8   : > { %v562_v57 = vmul.f32 %v1646_v30, %v542_v47  ;;  %v563_v58 = vmul.f32 %v1649_v31, %v541_v43  ;;  %v652_v44 = vsel %vm651_vm6, %v1574_v45, %v650_v52  ;;  %v653_v61 = vsel %vm651_vm6, %v650_v52, %v1574_v45 }
 0x1a9   : > { %v462_v62 = vmul.f32 1.442695, %v460_v54  ;;  %v464_v63 = vmul.f32 1.442695, %v461_v55  ;;  %v512_v0 = vmax.f32 %v1656_v33, %v510_v40  ;;  %v513_v1 = vmax.f32 %v1659_v34, %v511_v56  ;;  %v1685_v2 = vpop.permute.xlu1 %833 }
 0x1aa   : > { %v570_v4 = vadd.f32 %v1500_v18, %v562_v57  ;;  %v571_v5 = vadd.f32 %v1500_v18, %v563_v58  ;;  %v673_v8 = vmul.f32 %v1653_v32, %v652_v44  ;;  %v674_v13 = vmul.f32 %v1666_v48, %v653_v61  ;;  %v1699_v47 = vpop.permute.xlu0 %864 }
 0x1ab   : > { %v514_v11 = vsub.f32 %v1656_v33, %v512_v0  ;;  %v515_v45 = vsub.f32 %v1659_v34, %v513_v1  ;;  %v520_v12 = vsub.f32 %v510_v40, %v512_v0  ;;  %1166 = vpow2.f32 %v462_v62 }
 0x1ac   : > { %v521_v21 = vsub.f32 %v511_v56, %v513_v1  ;;  %v572_v15 = vmul.f32 %v570_v4, %v1509_v24  ;;  %v573_v23 = vmul.f32 %v571_v5, %v1516_v27  ;;  %1168 = vpow2.f32 %v464_v63 }
 0x1ad   : > { %v516_v18 = vmul.f32 1.442695, %v514_v11  ;;  %v518_v25 = vmul.f32 1.442695, %v515_v45  ;;  %v522_v28 = vmul.f32 1.442695, %v520_v12  ;;  %v385_v29 = vpop.permute.xlu1 %384  ;;  %v681_v43 = vadd.f32 %v1570_v41, %v673_v8 }
 0x1ae   : > { %v524_v35 = vmul.f32 1.442695, %v521_v21  ;;  %v574_v36 = vmax.f32 %v512_v0, %v572_v15  ;;  %v575_v39 = vmax.f32 %v513_v1, %v573_v23  ;;  %v682_v52 = vadd.f32 %v1570_v41, %v674_v13  ;;  %v847_v41 = vld [vmem:[#allocation2 + $0x10] ss:$8 sm:$0x3] }
 0x1af   : > { %1170 = vpow2.f32 %v516_v18  ;;  %v1704_v54 = vrot.slane %v785_v26, %v1502_v19  ;;  %v1707_v55 = vrot.slane %v785_v26, %v1504_v20  ;;  %v683_v5 = vmul.f32 %v681_v43, %v1509_v24 }
 0x1b0   : > { %1172 = vpow2.f32 %v518_v25  ;;  %v576_v40 = vsub.f32 %v512_v0, %v574_v36  ;;  %v577_v56 = vsub.f32 %v513_v1, %v575_v39  ;;  %v582_v57 = vsub.f32 %v572_v15, %v574_v36  ;;  %v383_v15 = vpop.permute.xlu0 %382 }
 0x1b1   : > { %1174 = vpow2.f32 %v522_v28  ;;  %v583_v58 = vsub.f32 %v573_v23, %v575_v39  ;;  %v623_v44 = vmax.f32 %v574_v36, %v1525_v37  ;;  %v624_v61 = vmax.f32 %v575_v39, %v1530_v38  ;;  %v712_v62 = vpop.permute.xlu1 %711 }
 0x1b2   : > { %1176 = vpow2.f32 %v524_v35  ;;  %v578_v63 = vmul.f32 1.442695, %v576_v40  ;;  %v580_v4 = vmul.f32 1.442695, %v577_v56  ;;  %v584_v0 = vmul.f32 1.442695, %v582_v57 }
 0x1b3   : > { %v625_v1 = vsub.f32 %v574_v36, %v623_v44  ;;  %v626_v8 = vsub.f32 %v575_v39, %v624_v61  ;;  %v631_v11 = vsub.f32 %v1525_v37, %v623_v44  ;;  %v586_v45 = vmul.f32 1.442695, %v583_v58 }
 0x1b4   : > { %v632_v12 = vsub.f32 %v1530_v38, %v624_v61  ;;  %v1717_v13 = vmul.f32 %v682_v52, %v1516_v27  ;;  %v1719_v21 = vmax.f32 %v623_v44, %v683_v5  ;;  %1178 = vpow2.f32 %v578_v63 }
 0x1b5   : > { %v627_v23 = vmul.f32 1.442695, %v625_v1  ;;  %v774_v26 = vpop.permute.xlu1 %773  ;;  %v1722_v18 = vrot.slane %v847_v41, %v1502_v19  ;;  %v1725_v25 = vrot.slane %v847_v41, %v1504_v20  ;;  %v1727_v28 = vpop.eup %1166  ;;  %1180 = vpow2.f32 %v580_v4 }
 0x1b6   : > { %v629_v37 = vmul.f32 1.442695, %v626_v8  ;;  %v1730_v38 = vmax.f32 %v624_v61, %v1717_v13  ;;  %v687_v35 = vsub.f32 %v623_v44, %v1719_v21  ;;  %v1733_v36 = vpop.eup %1168  ;;  %1182 = vpow2.f32 %v584_v0 }
 0x1b7   : > { %v633_v39 = vmul.f32 1.442695, %v631_v11  ;;  %v693_v43 = vsub.f32 %v683_v5, %v1719_v21  ;;  %v387_v19 = vsel %vm379_vm2, %v385_v29, %v383_v15  ;;  %1184 = vpow2.f32 %v586_v45 }
 0x1b8   : > { %v688_v20 = vsub.f32 %v624_v61, %v1730_v38  ;;  %v694_v52 = vsub.f32 %v1717_v13, %v1730_v38  ;;  %v1743_v40 = vsel %vm379_vm2, %v383_v15, %v385_v29  ;;  %1186 = vpow2.f32 %v627_v23 }
 0x1b9   : > { %v1745_v56 = vpop.eup %1170  ;;  %v635_v57 = vmul.f32 1.442695, %v632_v12  ;;  %v454_v58 = vsub.f32 %v1630_v16, %v1656_v33  ;;  %v455_v44 = vsub.f32 %v1633_v17, %v1659_v34  ;;  %v836_v41 = vpop.permute.xlu1 %835  ;;  %1188 = vpow2.f32 %v629_v37 }
 0x1ba   : > { %v1751_v63 = vpop.eup %1172  ;;  %v689_v61 = vmul.f32 1.442695, %v687_v35  ;;  %v1754_v4 = vmul.f32 %v1583_v50, %v387_v19  ;;  %v714_v29 = vsel %vm713_vm7, %v1639_v22, %v712_v62  ;;  %1190 = vpow2.f32 %v633_v39  ;;  %v422_v19 = vpop.permute.xlu0 %421 }
 0x1bb   : > { %v1759_v5 = vpop.eup %1174  ;;  %v691_v0 = vmul.f32 1.442695, %v688_v20  ;;  %v695_v16 = vmul.f32 1.442695, %v693_v43  ;;  %v715_v17 = vsel %vm713_vm7, %v712_v62, %v1639_v22  ;;  %v456_v34 = vmul.f32 1.442695, %v454_v58 }
 0x1bc   : > { %v1764_v33 = vpop.eup %1176  ;;  %v735_v1 = vmul.f32 %v1669_v53, %v714_v29  ;;  %v736_v50 = vmul.f32 %v1691_v10, %v715_v17  ;;  %v776_v8 = vsel %vm775_vm8, %v1579_v49, %v774_v26  ;;  %v458_v11 = vmul.f32 1.442695, %v455_v44 }
 0x1bd   : > { %v777_v45 = vsel %vm775_vm8, %v774_v26, %v1579_v49  ;;  %v797_v12 = vmul.f32 %v1704_v54, %v776_v8  ;;  %v838_v22 = vsel %vm837_vm9, %v1685_v2, %v836_v41  ;;  %1192 = vpow2.f32 %v635_v57  ;;  %v424_v23 = vpop.permute.xlu1 %423 }
 0x1be   : > { %v743_v62 = vadd.f32 %v1572_v42, %v735_v1  ;;  %v744_v13 = vadd.f32 %v1572_v42, %v736_v50  ;;  %v798_v15 = vmul.f32 %v1707_v55, %v777_v45  ;;  %v1781_v37 = vpop.eup %1178  ;;  %1194 = vpow2.f32 %v689_v61 }
 0x1bf   : > { %v805_v35 = vadd.f32 %v1608_v3, %v797_v12  ;;  %v839_v49 = vsel %vm837_vm9, %v836_v41, %v1685_v2  ;;  %v859_v26 = vmul.f32 %v1722_v18, %v838_v22  ;;  %v1788_v39 = vpop.eup %1180  ;;  %1196 = vpow2.f32 %v456_v34 }
 0x1c0   : > { %v745_v43 = vmul.f32 %v743_v62, %v1509_v24  ;;  %v746_v42 = vmul.f32 %v744_v13, %v1516_v27  ;;  %v806_v20 = vadd.f32 %v1608_v3, %v798_v15  ;;  %v1793_v57 = vpop.eup %1182  ;;  %1198 = vpow2.f32 %v458_v11 }
 0x1c1   : > { %v807_v58 = vmul.f32 %v805_v35, %v1509_v24  ;;  %v860_v44 = vmul.f32 %v1725_v25, %v839_v49  ;;  %v867_v2 = vadd.f32 %v1699_v47, %v859_v26  ;;  %v1798_v41 = vpop.eup %1184  ;;  %v425_v3 = vsel %vm418_vm3, %v422_v19, %v424_v23  ;;  %v1815_v13 = vpop.permute.xlu1 %483 }
 0x1c2   : > { %v747_v61 = vmax.f32 %v1719_v21, %v745_v43  ;;  %v748_v29 = vmax.f32 %v1730_v38, %v746_v42  ;;  %v808_v17 = vmul.f32 %v806_v20, %v1516_v27  ;;  %v1805_v34 = vpop.eup %1186  ;;  %1200 = vpow2.f32 %v691_v0  ;;  %v482_v49 = vpop.permute.xlu0 %481 }
 0x1c3   : > { %v697_v1 = vmul.f32 1.442695, %v694_v52  ;;  %v868_v50 = vadd.f32 %v1699_v47, %v860_v44  ;;  %v1809_v8 = vmul.f32 %v867_v2, %v1509_v24  ;;  %v1811_v11 = vpop.eup %1188  ;;  %v443_v24 = vmul.f32 %v1599_v60, %v425_v3 }
 0x1c4   : > { %v749_v45 = vsub.f32 %v1719_v21, %v747_v61  ;;  %v750_v12 = vsub.f32 %v1730_v38, %v748_v29  ;;  %v755_v22 = vsub.f32 %v745_v43, %v747_v61  ;;  %v756_v62 = vsub.f32 %v746_v42, %v748_v29  ;;  %v1817_v15 = vpop.eup %1190 }
 0x1c5   : > { %v809_v35 = vmax.f32 %v747_v61, %v807_v58  ;;  %v810_v0 = vmax.f32 %v748_v29, %v808_v17  ;;  %v1820_v52 = vmul.f32 %v868_v50, %v1516_v27  ;;  %1202 = vpow2.f32 %v695_v16 }
 0x1c6   : > { %v403_v47 = vmul.f32 %v1586_v51, %v1743_v40  ;;  %v751_v21 = vmul.f32 1.442695, %v749_v45  ;;  %v426_v38 = vsel %vm418_vm3, %v424_v23, %v422_v19  ;;  %v753_v26 = vmul.f32 1.442695, %v750_v12 }
 0x1c7   : > { %v811_v43 = vsub.f32 %v747_v61, %v809_v35  ;;  %v812_v42 = vsub.f32 %v748_v29, %v810_v0  ;;  %v817_v20 = vsub.f32 %v807_v58, %v809_v35  ;;  %v1827_v44 = vpop.eup %1192  ;;  %v757_v2 = vmul.f32 1.442695, %v755_v22 }
 0x1c8   : > { %v818_v27 = vsub.f32 %v808_v17, %v810_v0  ;;  %v871_v50 = vmax.f32 %v809_v35, %v1809_v8  ;;  %v1831_v60 = vmax.f32 %v810_v0, %v1820_v52  ;;  %v1833_v16 = vpop.eup %1194  ;;  %1204 = vpow2.f32 %v697_v1  ;;  %v546_v17 = vpop.permute.xlu1 %545 }
 0x1c9   : > { %v759_v51 = vmul.f32 1.442695, %v756_v62  ;;  %v442_v40 = vmul.f32 %v1596_v59, %v426_v38  ;;  %v471_v23 = vmul.f32 %v1733_v36, %v443_v24  ;;  %v1197_v19 = vpop.eup %1196  ;;  %1206 = vpow2.f32 %v751_v21  ;;  %v544_v24 = vpop.permute.xlu0 %543 }
 0x1ca   : > { %v813_v58 = vmul.f32 1.442695, %v811_v43  ;;  %v873_v61 = vsub.f32 %v809_v35, %v871_v50  ;;  %v874_v29 = vsub.f32 %v810_v0, %v1831_v60  ;;  %v1199_v3 = vpop.eup %1198  ;;  %v466_v45 = vadd.f32 %v1197_v19, %v1727_v28 }
 0x1cb   : > { %1208 = vpow2.f32 %v753_v26  ;;  %v815_v12 = vmul.f32 1.442695, %v812_v42  ;;  %v879_v22 = vsub.f32 %v1809_v8, %v871_v50  ;;  %v467_v1 = vadd.f32 %v1199_v3, %v1733_v36 }
 0x1cc   : > { %1210 = vpow2.f32 %v757_v2  ;;  %v819_v59 = vmul.f32 1.442695, %v817_v20  ;;  %v821_v62 = vmul.f32 1.442695, %v818_v27  ;;  %v1841_v38 = vpop.eup %1200  ;;  %v469_v21 = vmul.f32 %v1199_v3, %v403_v47 }
 0x1cd   : > { %v526_v35 = vmul.f32 %v1745_v56, %v466_v45  ;;  %1212 = vpow2.f32 %v759_v51  ;;  %v880_v0 = vsub.f32 %v1820_v52, %v1831_v60  ;;  %v468_v26 = vmul.f32 %v1197_v19, %v1754_v4  ;;  %v657_v52 = vpop.permute.xlu1 %656 }
 0x1ce   : > { %v527_v43 = vmul.f32 %v1751_v63, %v467_v1  ;;  %1214 = vpow2.f32 %v813_v58  ;;  %v470_v36 = vmul.f32 %v1727_v28, %v442_v40  ;;  %v875_v42 = vmul.f32 1.442695, %v873_v61 }
 0x1cf   : > { %v528_v8 = vadd.f32 %v1759_v5, %v526_v35  ;;  %1216 = vpow2.f32 %v815_v12  ;;  %v473_v20 = vadd.f32 %v471_v23, %v469_v21  ;;  %v1850_v2 = vpop.eup %1202  ;;  %v877_v27 = vmul.f32 1.442695, %v874_v29  ;;  %v655_v23 = vpop.permute.xlu0 %654 }
 0x1d0   : > { %v529_v47 = vadd.f32 %v1764_v33, %v527_v43  ;;  %v472_v50 = vadd.f32 %v470_v36, %v468_v26  ;;  %v485_v4 = vsel %vm478_vm4, %v482_v49, %v1815_v13  ;;  %1218 = vpow2.f32 %v819_v59 }
 0x1d1   : > { %v588_v60 = vmul.f32 %v1781_v37, %v528_v8  ;;  %v881_v28 = vmul.f32 1.442695, %v879_v22  ;;  %v486_v51 = vsel %vm478_vm4, %v1815_v13, %v482_v49  ;;  %1220 = vpow2.f32 %v821_v62 }
 0x1d2   : > { %v589_v40 = vmul.f32 %v1788_v39, %v529_v47  ;;  %v530_v19 = vmul.f32 %v1745_v56, %v472_v50  ;;  %v502_v58 = vmul.f32 %v1613_v6, %v486_v51  ;;  %v1863_v61 = vpop.eup %1204  ;;  %v531_v3 = vmul.f32 %v1751_v63, %v473_v20 }
 0x1d3   : > { %v590_v29 = vadd.f32 %v1793_v57, %v588_v60  ;;  %v503_v45 = vmul.f32 %v1616_v7, %v485_v4  ;;  %v547_v12 = vsel %vm540_vm5, %v544_v24, %v546_v17  ;;  %v1870_v13 = vpop.eup %1206  ;;  %v548_v6 = vsel %vm540_vm5, %v546_v17, %v544_v24  ;;  %v717_v20 = vpop.permute.xlu0 %716 }
 0x1d4   : > { %v591_v49 = vadd.f32 %v1798_v41, %v589_v40  ;;  %v532_v22 = vmul.f32 %v1759_v5, %v502_v58  ;;  %v565_v56 = vmul.f32 %v1649_v31, %v547_v12  ;;  %v564_v59 = vmul.f32 %v1646_v30, %v548_v6  ;;  %v719_v31 = vpop.permute.xlu1 %718 }
 0x1d5   : > { %v1877_v1 = vpop.eup %1208  ;;  %v637_v63 = vmul.f32 %v1805_v34, %v590_v29  ;;  %v533_v7 = vmul.f32 %v1764_v33, %v503_v45  ;;  %v643_v62 = vmul.f32 %v1817_v15, %v1620_v9  ;;  %v883_v5 = vmul.f32 1.442695, %v880_v0 }
 0x1d6   : > { %v1211_v21 = vpop.eup %1210  ;;  %v638_v35 = vmul.f32 %v1811_v11, %v591_v49  ;;  %v534_v26 = vadd.f32 %v532_v22, %v530_v19  ;;  %v644_v17 = vmul.f32 %v1827_v44, %v1627_v14  ;;  %v594_v33 = vmul.f32 %v1793_v57, %v564_v59 }
 0x1d7   : > { %v1213_v24 = vpop.eup %1212  ;;  %v639_v43 = vadd.f32 %v1817_v15, %v637_v63  ;;  %v535_v36 = vadd.f32 %v533_v7, %v531_v3  ;;  %v595_v30 = vmul.f32 %v1798_v41, %v565_v56  ;;  %1222 = vpow2.f32 %v875_v42  ;;  %v779_v3 = vpop.permute.xlu0 %778 }
 0x1d8   : > { %v1890_v8 = vpop.eup %1214  ;;  %v640_v9 = vadd.f32 %v1827_v44, %v638_v35  ;;  %v592_v0 = vmul.f32 %v1781_v37, %v534_v26  ;;  %1224 = vpow2.f32 %v877_v27  ;;  %v658_v57 = vsel %vm651_vm6, %v655_v23, %v657_v52 }
 0x1d9   : > { %v1894_v47 = vpop.eup %1216  ;;  %v699_v14 = vmul.f32 %v1833_v16, %v639_v43  ;;  %v593_v15 = vmul.f32 %v1788_v39, %v535_v36  ;;  %1226 = vpow2.f32 %v881_v28  ;;  %v659_v44 = vsel %vm651_vm6, %v657_v52, %v655_v23  ;;  %v781_v28 = vpop.permute.xlu1 %780 }
 0x1da   : > { %v700_v41 = vmul.f32 %v1841_v38, %v640_v9  ;;  %v596_v50 = vadd.f32 %v594_v33, %v592_v0  ;;  %v1219_v42 = vpop.eup %1218  ;;  %1228 = vpow2.f32 %v883_v5  ;;  %v675_v51 = vmul.f32 %v1653_v32, %v658_v57 }
 0x1db   : > { %v701_v37 = vadd.f32 %v1850_v2, %v699_v14  ;;  %v597_v4 = vadd.f32 %v595_v30, %v593_v15  ;;  %v1221_v60 = vpop.eup %1220  ;;  %v720_v40 = vsel %vm713_vm7, %v717_v20, %v719_v31  ;;  %v676_v23 = vmul.f32 %v1666_v48, %v659_v44 }
 0x1dc   : > { %v702_v27 = vadd.f32 %v1863_v61, %v700_v41  ;;  %v641_v39 = vmul.f32 %v1805_v34, %v596_v50  ;;  %v721_v58 = vsel %vm713_vm7, %v719_v31, %v717_v20  ;;  %v737_v32 = vmul.f32 %v1669_v53, %v720_v40 }
 0x1dd   : > { %v761_v19 = vmul.f32 %v1870_v13, %v701_v37  ;;  %v642_v52 = vmul.f32 %v1811_v11, %v597_v4  ;;  %v705_v6 = vmul.f32 %v1850_v2, %v675_v51  ;;  %v738_v11 = vmul.f32 %v1691_v10, %v721_v58  ;;  %v843_v35 = vpop.permute.xlu1 %842 }
 0x1de   : > { %v762_v29 = vmul.f32 %v1877_v1, %v702_v27  ;;  %v645_v45 = vadd.f32 %v643_v62, %v641_v39  ;;  %v706_v63 = vmul.f32 %v1863_v61, %v676_v23  ;;  %v782_v7 = vsel %vm775_vm8, %v779_v3, %v781_v28 }
 0x1df   : > { %v763_v34 = vadd.f32 %v1211_v21, %v761_v19  ;;  %v646_v12 = vadd.f32 %v644_v17, %v642_v52  ;;  %v767_v26 = vmul.f32 %v1211_v21, %v737_v32  ;;  %v768_v43 = vmul.f32 %v1213_v24, %v738_v11 }
 0x1e0   : > { %v764_v49 = vadd.f32 %v1213_v24, %v762_v29  ;;  %v703_v22 = vmul.f32 %v1833_v16, %v645_v45  ;;  %v783_v16 = vsel %vm775_vm8, %v781_v28, %v779_v3  ;;  %v799_v36 = vmul.f32 %v1704_v54, %v782_v7 }
 0x1e1   : > { %v823_v48 = vmul.f32 %v1890_v8, %v763_v34  ;;  %v704_v56 = vmul.f32 %v1841_v38, %v646_v12  ;;  %v1223_v59 = vpop.eup %1222  ;;  %v841_v38 = vpop.permute.xlu0 %840  ;;  %v800_v9 = vmul.f32 %v1707_v55, %v783_v16 }
 0x1e2   : > { %v824_v62 = vmul.f32 %v1894_v47, %v764_v49  ;;  %v707_v53 = vadd.f32 %v705_v6, %v703_v22  ;;  %v1225_v2 = vpop.eup %1224  ;;  %v844_v20 = vsel %vm837_vm9, %v841_v38, %v843_v35  ;;  %v845_v21 = vsel %vm837_vm9, %v843_v35, %v841_v38 }
 0x1e3   : > { %v825_v5 = vadd.f32 %v1219_v42, %v823_v48  ;;  %v708_v10 = vadd.f32 %v706_v63, %v704_v56  ;;  %v1227_v17 = vpop.eup %1226  ;;  %v829_v54 = vmul.f32 %v1219_v42, %v799_v36  ;;  %v861_v24 = vmul.f32 %v1722_v18, %v844_v20 }
 0x1e4   : > { %v826_v31 = vadd.f32 %v1221_v60, %v824_v62  ;;  %v765_v61 = vmul.f32 %v1870_v13, %v707_v53  ;;  %v1229_v33 = vpop.eup %1228  ;;  %v830_v50 = vmul.f32 %v1221_v60, %v800_v9  ;;  %v862_v44 = vmul.f32 %v1725_v25, %v845_v21 }
 0x1e5   : > { %v766_v30 = vmul.f32 %v1877_v1, %v708_v10  ;;  %v885_v0 = vmul.f32 %v1223_v59, %v825_v5  ;;  %v891_v27 = vmul.f32 %v1227_v17, %v861_v24 }
 0x1e6   : > { %v769_v14 = vadd.f32 %v767_v26, %v765_v61  ;;  %v886_v15 = vmul.f32 %v1225_v2, %v826_v31  ;;  %v892_v51 = vmul.f32 %v1229_v33, %v862_v44 }
 0x1e7   : > { %v770_v57 = vadd.f32 %v768_v43, %v766_v30  ;;  %v887_v41 = vadd.f32 %v1227_v17, %v885_v0 }
 0x1e8   : > { %v827_v13 = vmul.f32 %v1890_v8, %v769_v14  ;;  %v888_v1 = vadd.f32 %v1229_v33, %v886_v15 }
 0x1e9   : > { %v828_v55 = vmul.f32 %v1894_v47, %v770_v57  ;;  %1230 = vrcp.f32 %v887_v41 }
 0x1ea   : > { %v831_v37 = vadd.f32 %v829_v54, %v827_v13  ;;  %1232 = vrcp.f32 %v888_v1 }
 0x1eb   : > { %v832_v46 = vadd.f32 %v830_v50, %v828_v55 }
 0x1ec   : > { %v889_v4 = vmul.f32 %v1223_v59, %v831_v37 }
 0x1ed   : > { %v890_v39 = vmul.f32 %v1225_v2, %v832_v46 }
 0x1ee   : > { %v893_v40 = vadd.f32 %v891_v27, %v889_v4 }
 0x1ef   : > { %v894_v8 = vadd.f32 %v892_v51, %v890_v39 }
 0x1f3   : > { %v1231_v18 = vpop.eup %1230 }
 0x1f4   : > { %v1233_v42 = vpop.eup %1232  ;;  %v897_v28 = vmul.f32 %v1231_v18, %v893_v40 }
 0x1f5   : > { %v898_v47 = vmul.f32 %v1233_v42, %v894_v8 }
 0x1f6   : > { %v906_v60 = vmul.f32 %v897_v28, %v897_v28  ;;  %899 = vst [vmem:[%s260_s17] sm:$0xff] %v897_v28 }
 0x1f7   : > { %v901_v25 = vadd.f32 %v898_v47, %v897_v28  ;;  %v907_v19 = vmul.f32 %v898_v47, %v898_v47  ;;  %900 = vst [vmem:[%s260_s17 + $0x8] sm:$0xff] %v898_v47 }
 0x1f9   : > { %902 = vadd.xlane.f32.xlu0 %v901_v25  ;;  %v908_v52 = vadd.f32 %v907_v19, %v906_v60 }
 0x1fb   : > { %909 = vadd.xlane.f32.xlu1 %v908_v52 }
 0x1fc   : > { %1275 = shalt.err (!%p1272_p7)
}
 0x1fd   : > { %s1276_s25 = scalar_lea.hbm %s1944_s26, 256  ;;  %s1280_s16 = scalar_lea.hbm %s1991_s4, 512 }
 0x1fe   : > { %p1277_p8 = scmp.ne.s32.totalorder %s1944_s26, %s1276_s25  ;;  %p1281_p1 = scmp.lt.u32.totalorder %s1944_s26, %s1991_s4 }
 0x1ff   : > { %p1282_p0 = scmp.lt.u32.totalorder %s1280_s16, %s1276_s25  ;;  %p1284_p6 = scmp.lt.u32.totalorder %s1276_s25, %s1944_s26 }
 0x200   : > { %p1278_p11 = pnand %p1277_p8, %p2004_p9 }
 0x201   : > { %p1283_p5 = por %p1282_p0, %p1281_p1 }
 0x202   : > { %p1279_p13 = pneg %p1278_p11 }
 0x203   : > { %p1285_p10 = por %p1284_p6, %p1283_p5 }
 0x205   : > { %p1286_p12 = pnand %p1285_p10, %p1279_p13 }
 0x207   : > { %1289 = shalt.err (!%p1286_p12)
}
 0x208   : > { %1090 = dma.vmem_to_hbm [thread:$0]  (%p2004_p9), %s936_s28, 256, %s1944_s26, %s913_s29   ;;  %vm904_vm10 = vcmask 7168  }
 0x209   : > { %s1069_s19 = sshll.u32 %s1471_s12, 3 }
 0x20a   : > { %s281_s9 = scalar_lea.vmem %s1992_s5, %s1069_s19  ;;  %s285_s14 = scalar_lea.vmem %s1993_s6, %s1069_s19 }
 0x286   : > { %v903_v23 = vpop.xlane.xlu0 %902 }
 0x287   : > { %905 = vst.msk [vmem:[%s281_s9] sm:$0xff] %vm904_vm10, %v903_v23 }
 0x288   : > { %v910_v58 = vpop.xlane.xlu1 %909 }
 0x289   : > { %911 = vst.msk [vmem:[%s285_s14] sm:$0xff] %vm904_vm10, %v910_v58 }
 0x28a PF: > { %p1102_p2 = scmp.ge.s32.totalorder %s1328_s24, 2  ;;  %s953_s7 = sand.u32 1, %s1316_s21  }
 0x28b   : > { %p2005_p9 = scmp.ne.s32.totalorder %s1998_s8, 0  ;;  %s954_s12 = scalar_lea.sflag [#allocation4], %s953_s7 }
 0x28d   : > { %p1097_p3 = pnand %p1102_p2, %p2005_p9 }
 0x28f   : > { %1311 = dma.done.wait (!%p1097_p3), %s954_s12, 256  }
 0x290   : > { %1313 = vsyncadd (!%p1097_p3), %s954_s12, 4294967040  ;;  %p18_p4 = scmp.ge.s32.totalorder %s1411_s27, 4   ;;  %s2006_s21 = smov %s1320_s22 }
 0x291   : > { %s2007_s22 = smov %s1324_s23  ;;  %s2008_s23 = smov %s1422_s30 }
 0x292   : > { %s2009_s24 = smov %s1411_s27  ;;  %20 = sbr.rel (!%p18_p4) target bundleno = 4 (0x4), region = 108 }
 0x299   :  { %973 = vsyncpa [#allocation3], 1 }
 0x29a   :  { %975 = vsyncpa [#allocation3 + $0x1], 1 }
 0x29b   :  { %976 = vsyncpa [#allocation4], 1 }
 0x29c   :  { %978 = vsyncpa [#allocation4 + $0x1], 1 }

</bundles_post_ra>
